<compile_context>
chip_gen: v5e
topology: v5e:2x2
jax: 0.10.0
libtpu: 0.0.40
codegen_flags: <defaults>
</compile_context>

<pallas_src>
import functools

import jax
import jax.numpy as jnp
from jax.experimental import pallas as pl
from jax.experimental.pallas import tpu as pltpu


def _round_up(x, m):
    return ((x + m - 1) // m) * m


def _cnn_encoder_kernel(x_ref, w_ref, b_ref, mnf_ref, mnl_ref, o_ref, *,
                        seqs_per_block, seq_len, hidden_pad):
    # x_ref:   (TB*L, D)  -- TB whole sequences, flattened along M
    # w_ref:   (3, D, Hp) -- conv taps (PyTorch (H, D, K) transposed + H padded)
    # b_ref:   (1, Hp)
    # mnf_ref: (TB*L, 1)  -- 0.0 where t == 0     (no "previous token" inside seq)
    # mnl_ref: (TB*L, 1)  -- 0.0 where t == L - 1 (no "next token" inside seq)
    # o_ref:   (TB, Hp)
    x = x_ref[...]                                            # (N, D)
    d = x.shape[-1]
    zero_row = jnp.zeros((1, d), dtype=x.dtype)

    # conv taps: out[t] = x[t-1] @ w0 + x[t] @ w1 + x[t+1] @ w2, zero outside sequence.
    # Explicit slice+concat shifts (unambiguous semantics); cross-sequence rows are
    # zeroed by the masks, so the flattened slab behaves like per-sequence zero padding.
    x_prev = jnp.concatenate([zero_row, x[:-1, :]], axis=0) * mnf_ref[...]
    x_next = jnp.concatenate([x[1:, :], zero_row], axis=0) * mnl_ref[...]

    acc = jnp.dot(x_prev, w_ref[0], preferred_element_type=jnp.float32)
    acc = acc + jnp.dot(x, w_ref[1], preferred_element_type=jnp.float32)
    acc = acc + jnp.dot(x_next, w_ref[2], preferred_element_type=jnp.float32)

    # Per-sequence max over L, then fold bias + ReLU after the max
    # (valid because ReLU is monotone and the bias is constant over L).
    acc = acc.reshape(seqs_per_block, seq_len, hidden_pad)    # (TB, L, Hp)
    m = jnp.max(acc, axis=1)                                  # (TB, Hp)
    o_ref[...] = jnp.maximum(m + b_ref[...], 0.0)


def cnn_encode_pallas(x, w_kdh, bias, *, block_rows_target=512):
    """x: (B, L, D) f32, w_kdh: (3, D, H) f32, bias: (1, H) f32 -> (B, H) f32."""
    B, L, D = x.shape
    H = w_kdh.shape[-1]
    Hp = _round_up(H, 128)                     # lane-dense output / MXU N dim

    # Batch tile: multiple of 8 sequences, ~block_rows_target rows of M per grid step.
    tb = max(1, min(B, block_rows_target // max(L, 1)))
    tb = _round_up(tb, 8)
    b_pad = _round_up(B, tb)
    n_rows = tb * L
    grid = b_pad // tb

    # Pad H to a multiple of 128 (zeros contribute nothing; sliced off below).
    w_p = jnp.pad(w_kdh.astype(jnp.float32), ((0, 0), (0, 0), (0, Hp - H)))
    b_p = jnp.pad(bias.reshape(1, H).astype(jnp.float32), ((0, 0), (0, Hp - H)))

    # Flatten batch*length into the matmul M dimension; pad batch with zero sequences.
    x_flat = x.astype(jnp.float32).reshape(B * L, D)
    if b_pad != B:
        x_flat = jnp.pad(x_flat, ((0, (b_pad - B) * L), (0, 0)))

    # Sequence-boundary masks (same pattern for every grid block of TB sequences).
    t = jnp.arange(n_rows, dtype=jnp.int32) % L
    mask_not_first = (t != 0).astype(jnp.float32)[:, None]       # (TB*L, 1)
    mask_not_last = (t != L - 1).astype(jnp.float32)[:, None]    # (TB*L, 1)

    kernel = functools.partial(_cnn_encoder_kernel, seqs_per_block=tb,
                               seq_len=L, hidden_pad=Hp)
    flops = 2 * 3 * b_pad * L * D * Hp
    bytes_accessed = 4 * (b_pad * L * D + 3 * D * Hp + Hp + 2 * n_rows + b_pad * Hp)

    out = pl.pallas_call(
        kernel,
        out_shape=jax.ShapeDtypeStruct((b_pad, Hp), jnp.float32),
        grid_spec=pltpu.PrefetchScalarGridSpec(
            num_scalar_prefetch=0,
            grid=(grid,),
            in_specs=[
                pl.BlockSpec((n_rows, D), lambda bi: (bi, 0)),    # TB whole sequences
                pl.BlockSpec((3, D, Hp), lambda bi: (0, 0, 0)),   # weights (resident)
                pl.BlockSpec((1, Hp), lambda bi: (0, 0)),         # bias (resident)
                pl.BlockSpec((n_rows, 1), lambda bi: (0, 0)),     # boundary mask (t==0)
                pl.BlockSpec((n_rows, 1), lambda bi: (0, 0)),     # boundary mask (t==L-1)
            ],
            out_specs=pl.BlockSpec((tb, Hp), lambda bi: (bi, 0)),
        ),
        compiler_params=pltpu.CompilerParams(
            dimension_semantics=("parallel",)),
        cost_estimate=pl.CostEstimate(flops=flops, transcendentals=0,
                                      bytes_accessed=bytes_accessed),
    )(x_flat, w_p, b_p, mask_not_first, mask_not_last)
    return out[:B, :H]


class CNNSentenceEncoderPallas:
    """JAX/Pallas equivalent of fewshot_re_kit CNNSentenceEncoder forward."""

    def __init__(self, word_vec_mat, max_length, word_embedding_dim=50,
                 pos_embedding_dim=5, hidden_size=230, key=None):
        self.max_length = max_length
        self.hidden_size = hidden_size
        D = word_embedding_dim + 2 * pos_embedding_dim
        if key is None:
            key = jax.random.PRNGKey(0)
        k1, k2, k3, k4 = jax.random.split(key, 4)

        # Embedding tables (word table from word_vec_mat; position tables synthetic).
        self.word_emb = jnp.asarray(word_vec_mat, jnp.float32)        # (V, word_dim)
        self.pos1_emb = 0.1 * jax.random.normal(
            k1, (2 * max_length, pos_embedding_dim), jnp.float32)
        self.pos2_emb = 0.1 * jax.random.normal(
            k2, (2 * max_length, pos_embedding_dim), jnp.float32)

        # Conv1d(D, hidden, kernel_size=3, padding=1) parameters, PyTorch layout (H, D, 3).
        fan_in = D * 3
        bound = 1.0 / (fan_in ** 0.5)
        conv_weight = jax.random.uniform(
            k3, (hidden_size, D, 3), jnp.float32, -bound, bound)
        self.conv_bias = jax.random.uniform(
            k4, (1, hidden_size), jnp.float32, -bound, bound)
        # (H, D, 3) -> (3, D, H) for the kernel.
        self.conv_weight_kdh = jnp.transpose(conv_weight, (2, 1, 0))

    def _embed(self, word, pos1, pos2):
        # Embedding gathers are glue; done in plain JAX.
        e_w = jnp.take(self.word_emb, word, axis=0)     # (B, L, word_dim)
        e_p1 = jnp.take(self.pos1_emb, pos1, axis=0)    # (B, L, pos_dim)
        e_p2 = jnp.take(self.pos2_emb, pos2, axis=0)    # (B, L, pos_dim)
        return jnp.concatenate([e_w, e_p1, e_p2], axis=-1)  # (B, L, D)

    def forward(self, word, pos1, pos2):
        x = self._embed(word, pos1, pos2)                               # (B, L, D)
        return cnn_encode_pallas(x, self.conv_weight_kdh, self.conv_bias)

    def forward_reference(self, word, pos1, pos2):
        # Pure-JAX reference of the same math (for validation).
        x = self._embed(word, pos1, pos2)
        x_padded = jnp.pad(x, ((0, 0), (1, 1), (0, 0)))
        L = x.shape[1]
        out = jnp.zeros((x.shape[0], L, self.hidden_size), jnp.float32) \
            + self.conv_bias[None]
        for k in range(3):
            out = out + jnp.einsum(
                "bld,dh->blh", x_padded[:, k:k + L, :], self.conv_weight_kdh[k],
                precision=jax.lax.Precision.HIGHEST)
        out = jnp.maximum(out, 0.0)
        return jnp.max(out, axis=1)                                     # (B, H)


if __name__ == "__main__":
    # Small deterministic example consistent with the module's constructor.
    batch = 2
    max_length = 16
    word_embedding_dim = 50
    pos_embedding_dim = 5
    hidden_size = 230
    vocab_size = 20

    key = jax.random.PRNGKey(0)
    k_vec, k_mod, k_w, k_p1, k_p2 = jax.random.split(key, 5)

    word_vec_mat = 0.5 * jax.random.normal(
        k_vec, (vocab_size, word_embedding_dim), jnp.float32)

    enc = CNNSentenceEncoderPallas(
        word_vec_mat, max_length,
        word_embedding_dim=word_embedding_dim,
        pos_embedding_dim=pos_embedding_dim,
        hidden_size=hidden_size,
        key=k_mod)

    # Tokenized inputs like CNNSentenceEncoder.tokenize produces:
    # word ids in [0, vocab), pos indices in [0, 2*max_length).
    word = jax.random.randint(k_w, (batch, max_length), 0, vocab_size, jnp.int32)
    pos1 = jax.random.randint(k_p1, (batch, max_length), 0, 2 * max_length, jnp.int32)
    pos2 = jax.random.randint(k_p2, (batch, max_length), 0, 2 * max_length, jnp.int32)

    out = enc.forward(word, pos1, pos2)
    out = jax.block_until_ready(out)

    ref = jax.block_until_ready(enc.forward_reference(word, pos1, pos2))
    assert out.shape == (batch, hidden_size), out.shape
    assert jnp.allclose(out, ref, rtol=2e-4, atol=2e-4), \
        float(jnp.max(jnp.abs(out - ref)))

    print("KERNEL_OK")
</pallas_src>

<mosaic_0001>
module attributes {stable_mosaic.version = 11 : i64} {
  func.func @_cnn_encoder_kernel(%arg0: i32, %arg1: memref<128x60xf32, #tpu.memory_space<vmem>>, %arg2: memref<3x60x256xf32, #tpu.memory_space<vmem>>, %arg3: memref<1x256xf32, #tpu.memory_space<vmem>>, %arg4: memref<128x1xf32, #tpu.memory_space<vmem>>, %arg5: memref<128x1xf32, #tpu.memory_space<vmem>>, %arg6: memref<8x256xf32, #tpu.memory_space<vmem>>) attributes {dimension_semantics = [#tpu.dimension_semantics<parallel>], iteration_bounds = array<i64: 1>, scalar_prefetch = 0 : i64, scratch_operands = 0 : i64, tpu.core_type = #tpu.core_type<tc>, window_params = [{transform_indices = @transform_0, window_bounds = array<i64: 128, 60>}, {pipeline_mode = #tpu.pipeline_mode<synchronous>, transform_indices = @transform_1, window_bounds = array<i64: 3, 60, 256>}, {pipeline_mode = #tpu.pipeline_mode<synchronous>, transform_indices = @transform_2, window_bounds = array<i64: 1, 256>}, {pipeline_mode = #tpu.pipeline_mode<synchronous>, transform_indices = @transform_3, window_bounds = array<i64: 128, 1>}, {pipeline_mode = #tpu.pipeline_mode<synchronous>, transform_indices = @transform_4, window_bounds = array<i64: 128, 1>}, {transform_indices = @transform_5, window_bounds = array<i64: 8, 256>}]} {
    %c0 = arith.constant 0 : index
    %c0_0 = arith.constant 0 : index
    %0 = vector.load %arg1[%c0, %c0_0] : memref<128x60xf32, #tpu.memory_space<vmem>>, vector<128x60xf32>
    %cst = arith.constant 0.000000e+00 : f32
    %1 = vector.broadcast %cst : f32 to vector<1x60xf32>
    %2 = vector.extract_strided_slice %0 {offsets = [0, 0], sizes = [127, 60], strides = [1, 1]} : vector<128x60xf32> to vector<127x60xf32>
    %3 = tpu.concatenate %1, %2 in 0 : vector<1x60xf32>, vector<127x60xf32> -> vector<128x60xf32>
    %c0_1 = arith.constant 0 : index
    %c0_2 = arith.constant 0 : index
    %4 = vector.load %arg4[%c0_1, %c0_2] : memref<128x1xf32, #tpu.memory_space<vmem>>, vector<128x1xf32>
    %5 = vector.broadcast %4 : vector<128x1xf32> to vector<128x60xf32>
    %6 = arith.mulf %3, %5 : vector<128x60xf32>
    %7 = vector.extract_strided_slice %0 {offsets = [1, 0], sizes = [127, 60], strides = [1, 1]} : vector<128x60xf32> to vector<127x60xf32>
    %8 = tpu.concatenate %7, %1 in 0 : vector<127x60xf32>, vector<1x60xf32> -> vector<128x60xf32>
    %c0_3 = arith.constant 0 : index
    %c0_4 = arith.constant 0 : index
    %9 = vector.load %arg5[%c0_3, %c0_4] : memref<128x1xf32, #tpu.memory_space<vmem>>, vector<128x1xf32>
    %10 = vector.broadcast %9 : vector<128x1xf32> to vector<128x60xf32>
    %11 = arith.mulf %8, %10 : vector<128x60xf32>
    %c0_5 = arith.constant 0 : index
    %c0_6 = arith.constant 0 : index
    %c0_7 = arith.constant 0 : index
    %12 = vector.load %arg2[%c0_5, %c0_6, %c0_7] : memref<3x60x256xf32, #tpu.memory_space<vmem>>, vector<1x60x256xf32>
    %13 = vector.shape_cast %12 : vector<1x60x256xf32> to vector<60x256xf32>
    %cst_8 = arith.constant dense<0.000000e+00> : vector<128x256xf32>
    %14 = tpu.matmul %6, %13, %cst_8 {dimension_numbers = #tpu.dot_dimension_numbers<[1], [0], [0], [1], [0, 0, 1, 1], [], []>} : vector<128x60xf32>, vector<60x256xf32>, vector<128x256xf32> -> vector<128x256xf32>
    %c1 = arith.constant 1 : index
    %c0_9 = arith.constant 0 : index
    %c0_10 = arith.constant 0 : index
    %15 = vector.load %arg2[%c1, %c0_9, %c0_10] : memref<3x60x256xf32, #tpu.memory_space<vmem>>, vector<1x60x256xf32>
    %16 = vector.shape_cast %15 : vector<1x60x256xf32> to vector<60x256xf32>
    %cst_11 = arith.constant dense<0.000000e+00> : vector<128x256xf32>
    %17 = tpu.matmul %0, %16, %cst_11 {dimension_numbers = #tpu.dot_dimension_numbers<[1], [0], [0], [1], [0, 0, 1, 1], [], []>} : vector<128x60xf32>, vector<60x256xf32>, vector<128x256xf32> -> vector<128x256xf32>
    %18 = arith.addf %14, %17 : vector<128x256xf32>
    %c2 = arith.constant 2 : index
    %c0_12 = arith.constant 0 : index
    %c0_13 = arith.constant 0 : index
    %19 = vector.load %arg2[%c2, %c0_12, %c0_13] : memref<3x60x256xf32, #tpu.memory_space<vmem>>, vector<1x60x256xf32>
    %20 = vector.shape_cast %19 : vector<1x60x256xf32> to vector<60x256xf32>
    %cst_14 = arith.constant dense<0.000000e+00> : vector<128x256xf32>
    %21 = tpu.matmul %11, %20, %cst_14 {dimension_numbers = #tpu.dot_dimension_numbers<[1], [0], [0], [1], [0, 0, 1, 1], [], []>} : vector<128x60xf32>, vector<60x256xf32>, vector<128x256xf32> -> vector<128x256xf32>
    %22 = arith.addf %18, %21 : vector<128x256xf32>
    %23 = vector.shape_cast %22 : vector<128x256xf32> to vector<8x16x256xf32>
    %cst_15 = arith.constant dense<0xFF800000> : vector<8x256xf32>
    %24 = vector.multi_reduction <maximumf>, %23, %cst_15 [1] : vector<8x16x256xf32> to vector<8x256xf32>
    %c0_16 = arith.constant 0 : index
    %c0_17 = arith.constant 0 : index
    %25 = vector.load %arg3[%c0_16, %c0_17] : memref<1x256xf32, #tpu.memory_space<vmem>>, vector<1x256xf32>
    %26 = vector.broadcast %25 : vector<1x256xf32> to vector<8x256xf32>
    %27 = arith.addf %24, %26 : vector<8x256xf32>
    %cst_18 = arith.constant 0.000000e+00 : f32
    %28 = vector.broadcast %cst_18 : f32 to vector<8x256xf32>
    %29 = arith.maximumf %27, %28 : vector<8x256xf32>
    %c0_19 = arith.constant 0 : index
    %c0_20 = arith.constant 0 : index
    %30 = vector.load %arg6[%c0_19, %c0_20] : memref<8x256xf32, #tpu.memory_space<vmem>>, vector<8x256xf32>
    tpu.vector_store %arg6[%c0_19, %c0_20], %29 {strides = array<i32>} : memref<8x256xf32, #tpu.memory_space<vmem>>, vector<8x256xf32>,
    return
  }
  func.func @transform_0(%arg0: i32) -> (i32, i32) {
    %c0_i32 = arith.constant 0 : i32
    %c0_i32_0 = arith.constant 0 : i32
    return %arg0, %c0_i32 : i32, i32
  }
  func.func @transform_1(%arg0: i32) -> (i32, i32, i32) {
    %c0_i32 = arith.constant 0 : i32
    %c0_i32_0 = arith.constant 0 : i32
    %c0_i32_1 = arith.constant 0 : i32
    %c0_i32_2 = arith.constant 0 : i32
    return %c0_i32, %c0_i32_0, %c0_i32_1 : i32, i32, i32
  }
  func.func @transform_2(%arg0: i32) -> (i32, i32) {
    %c0_i32 = arith.constant 0 : i32
    %c0_i32_0 = arith.constant 0 : i32
    %c0_i32_1 = arith.constant 0 : i32
    return %c0_i32, %c0_i32_0 : i32, i32
  }
  func.func @transform_3(%arg0: i32) -> (i32, i32) {
    %c0_i32 = arith.constant 0 : i32
    %c0_i32_0 = arith.constant 0 : i32
    %c0_i32_1 = arith.constant 0 : i32
    return %c0_i32, %c0_i32_0 : i32, i32
  }
  func.func @transform_4(%arg0: i32) -> (i32, i32) {
    %c0_i32 = arith.constant 0 : i32
    %c0_i32_0 = arith.constant 0 : i32
    %c0_i32_1 = arith.constant 0 : i32
    return %c0_i32, %c0_i32_0 : i32, i32
  }
  func.func @transform_5(%arg0: i32) -> (i32, i32) {
    %c0_i32 = arith.constant 0 : i32
    %c0_i32_0 = arith.constant 0 : i32
    return %arg0, %c0_i32 : i32, i32
  }
}

</mosaic_0001>

<bundles_post_ra>
// kernel: tpu_custom_call.1
= control target key start
LH: loop header
LB: loop body
LE: loop exit
PB: predicated region body
PF: predicated region fallthrough
CT: control target
= control target key end

     0   :  { %v1397_v3 = vmov 0   ;;  %vm441_vm0 = vcmask 1043456   ;;  %s2111_s0 = inlined_call_operand.vmem [shape: f32[128,60], index: 0, kind: input, shape index: {}]   ;;  %s2112_s1 = inlined_call_operand.vmem [shape: f32[3,60,256], index: 1, kind: input, shape index: {}]   ;;  %s2113_s2 = inlined_call_operand.vmem [shape: f32[1,256], index: 2, kind: input, shape index: {}]   ;;  %s2114_s3 = inlined_call_operand.vmem [shape: f32[128,1], index: 3, kind: input, shape index: {}]   ;;  %s2115_s4 = inlined_call_operand.vmem [shape: f32[128,1], index: 4, kind: input, shape index: {}]   ;;  %s2116_s5 = inlined_call_operand.hbm [shape: f32[8,256], index: 5, kind: output, shape index: {}]  }
   0x1   :  { %v264_v0 = vld [vmem:[%s2115_s4 + $0x8] sm:$0xff]  ;;  %v263_v1 = vld [vmem:[%s2115_s4] sm:$0xff]  ;;  %1370 = vset.pattern.permute.xlu2 %v1397_v3  ;;  %1369 = vset.pattern.permute.xlu1 %v1397_v3  ;;  %v1230_v4 = vld [vmem:[%s2112_s1 + $0xf0] sm:$0xf] }
   0x2   :  { %v102_v2 = vld [vmem:[%s2114_s3] sm:$0xff]  ;;  %1368 = vset.pattern.permute.xlu0 %v1397_v3  ;;  %286 = vperm.xlu2 %1370, %v264_v0   ;;  %v1231_v5 = vld [vmem:[%s2112_s1 + $0xf8] sm:$0xf]  ;;  %v1229_v7 = vld [vmem:[%s2112_s1 + $0xe8] sm:$0xff] }
   0x3   :  { %281 = vperm.xlu1 %1369, %v263_v1   ;;  %120 = vperm.xlu0 %1368, %v102_v2   ;;  %v1228_v6 = vld [vmem:[%s2112_s1 + $0xe0] sm:$0xff] }
   0x4   :  { %1232 = vmatpush.msk.msra.mxu0 %vm441_vm0, %v1230_v4  ;;  %1350 = vmatpush.msk.msra.mxu2 %vm441_vm0, %v1230_v4 }
   0x5   :  { %10 = vsyncpa [#allocation3], 0  ;;  %v105_v8 = vld [vmem:[%s2114_s3 + $0x18] sm:$0xff]  ;;  %1249 = vmatpush.msk.msra.mxu1 %vm441_vm0, %v1231_v5  ;;  %1358 = vmatpush.msk.msra.mxu3 %vm441_vm0, %v1231_v5  ;;  %v104_v9 = vld [vmem:[%s2114_s3 + $0x10] sm:$0xff]  ;;  %vm408_vm1 = vcmask 490496   ;;  %vm214_vm2 = vcmask 1046528  }
   0x6   :  { %v103_v10 = vld [vmem:[%s2114_s3 + $0x8] sm:$0xff]  ;;  %457 = vmatpush.msra.mxu0 %v1228_v6  ;;  %1351 = vmatpush.msra.mxu2 %v1228_v6  ;;  %v1226_v11 = vld [vmem:[%s2112_s1 + $0xd0] sm:$0xff]  ;;  %v1227_v12 = vld [vmem:[%s2112_s1 + $0xd8] sm:$0xff]  ;;  %vm53_vm3 = vcmask 1040384   ;;  %vm1162_vm4 = vcmask 1041409   ;;  %vm1165_vm5 = vcmask 1042434  }
   0x7   :  { %522 = vmatpush.msra.mxu1 %v1229_v7  ;;  %1359 = vmatpush.msra.mxu3 %v1229_v7  ;;  %v1224_v13 = vld [vmem:[%s2112_s1 + $0xc0] sm:$0xff]  ;;  %v1225_v14 = vld [vmem:[%s2112_s1 + $0xc8] sm:$0xff]  ;;  %v1222_v15 = vld [vmem:[%s2112_s1 + $0xb0] sm:$0xff]  ;;  %vm1168_vm6 = vcmask 1043459   ;;  %vm1171_vm7 = vcmask 1044484   ;;  %vm1174_vm8 = vcmask 1045509  }
   0x8   :  { %458 = vmatpush.msra.mxu0 %v1226_v11  ;;  %1352 = vmatpush.msra.mxu2 %v1226_v11  ;;  %v1223_v16 = vld [vmem:[%s2112_s1 + $0xb8] sm:$0xff]  ;;  %v1220_v18 = vld [vmem:[%s2112_s1 + $0xa0] sm:$0xff]  ;;  %v265_v20 = vld [vmem:[%s2115_s4 + $0x10] sm:$0xff]  ;;  %vm1177_vm9 = vcmask 1046534   ;;  %vm1180_vm10 = vcmask 1047559   ;;  %s1207_s11 = sshll.u32 %s2116_s5, 4  ;;  %s1208_s11 = int_to_ptr.hbm [resolvable:$true] %s1207_s11 }
   0x9   :  { %523 = vmatpush.msra.mxu1 %v1227_v12  ;;  %1360 = vmatpush.msra.mxu3 %v1227_v12  ;;  %v266_v17 = vld [vmem:[%s2115_s4 + $0x18] sm:$0xff]  ;;  %v106_v19 = vld [vmem:[%s2114_s3 + $0x20] sm:$0xff]  ;;  %v1221_v21 = vld [vmem:[%s2112_s1 + $0xa8] sm:$0xff] }
   0xa   :  { %135 = vperm.xlu2 %1370, %v105_v8   ;;  %459 = vmatpush.msra.mxu0 %v1224_v13  ;;  %v1218_v22 = vld [vmem:[%s2112_s1 + $0x90] sm:$0xff]  ;;  %v1219_v23 = vld [vmem:[%s2112_s1 + $0x98] sm:$0xff]  ;;  %v1216_v24 = vld [vmem:[%s2112_s1 + $0x80] sm:$0xff] }
   0xb   :  { %130 = vperm.xlu1 %1369, %v104_v9   ;;  %125 = vperm.xlu0 %1368, %v103_v10   ;;  %v1217_v25 = vld [vmem:[%s2112_s1 + $0x88] sm:$0xff]  ;;  %v1511_v26 = vld [vmem:[%s2111_s0] sm:$0xff]  ;;  %v108_v27 = vld [vmem:[%s2114_s3 + $0x30] sm:$0xff] }
   0xc   :  { %1353 = vmatpush.msra.mxu2 %v1224_v13  ;;  %524 = vmatpush.msra.mxu1 %v1225_v14  ;;  %v1519_v28 = vld [vmem:[%s2111_s0 + $0x40] sm:$0xff]  ;;  %v107_v30 = vld [vmem:[%s2114_s3 + $0x28] sm:$0xff]  ;;  %v389_v31 = vld [vmem:[%s2112_s1 + $0x70] sm:$0xf] }
   0xd   :  { %1361 = vmatpush.msra.mxu3 %v1225_v14  ;;  %460 = vmatpush.msra.mxu0 %v1222_v15  ;;  %v267_v29 = vld [vmem:[%s2115_s4 + $0x20] sm:$0xff]  ;;  %v390_v32 = vld [vmem:[%s2112_s1 + $0x78] sm:$0xf]  ;;  %v388_v34 = vld [vmem:[%s2112_s1 + $0x68] sm:$0xff] }
   0xe   :  { %1354 = vmatpush.msra.mxu2 %v1222_v15  ;;  %525 = vmatpush.msra.mxu1 %v1223_v16  ;;  %v387_v33 = vld [vmem:[%s2112_s1 + $0x60] sm:$0xff]  ;;  %v1314_v35 = vld [vmem:[%s2112_s1 + $0x170] sm:$0xf]  ;;  %v1315_v36 = vld [vmem:[%s2112_s1 + $0x178] sm:$0xf] }
   0xf   :  { %1362 = vmatpush.msra.mxu3 %v1223_v16  ;;  %461 = vmatpush.msra.mxu0 %v1220_v18  ;;  %v1558_v37 = vld [vmem:[%s2111_s0 + $0x8] sm:$0xff]  ;;  %v269_v38 = vld [vmem:[%s2115_s4 + $0x30] sm:$0xff]  ;;  %v109_v40 = vld [vmem:[%s2114_s3 + $0x38] sm:$0xff] }
  0x10   :  { %1355 = vmatpush.msra.mxu2 %v1220_v18  ;;  %526 = vmatpush.msra.mxu1 %v1221_v21  ;;  %v1568_v39 = vld [vmem:[%s2111_s0 + $0x48] sm:$0xff]  ;;  %v385_v42 = vld [vmem:[%s2112_s1 + $0x50] sm:$0xff]  ;;  %v386_v43 = vld [vmem:[%s2112_s1 + $0x58] sm:$0xff]  ;;  %v216_v5 = vrot.slane %v1558_v37, 1 }
  0x11   :  { %1363 = vmatpush.msra.mxu3 %v1221_v21  ;;  %462 = vmatpush.msra.mxu0 %v1218_v22  ;;  %v268_v41 = vld [vmem:[%s2115_s4 + $0x28] sm:$0xff]  ;;  %v1312_v44 = vld [vmem:[%s2112_s1 + $0x160] sm:$0xff]  ;;  %v1599_v46 = vld [vmem:[%s2111_s0 + $0x10] sm:$0xff] }
  0x12   :  { %296 = vperm.xlu2 %1370, %v266_v17   ;;  %1356 = vmatpush.msra.mxu2 %v1218_v22  ;;  %v1313_v45 = vld [vmem:[%s2112_s1 + $0x168] sm:$0xff]  ;;  %v1607_v48 = vld [vmem:[%s2111_s0 + $0x50] sm:$0xff]  ;;  %v270_v49 = vld [vmem:[%s2115_s4 + $0x38] sm:$0xff]  ;;  %v218_v6 = vrot.slane %v1599_v46, 1  ;;  %v57_v17 = vrot.slane %v1599_v46, 7 }
  0x13   :  { %140 = vperm.xlu1 %1369, %v106_v19   ;;  %291 = vperm.xlu0 %1368, %v265_v20   ;;  %v111_v47 = vld [vmem:[%s2114_s3 + $0x48] sm:$0xff]  ;;  %v110_v50 = vld [vmem:[%s2114_s3 + $0x40] sm:$0xff]  ;;  %v1310_v53 = vld [vmem:[%s2112_s1 + $0x150] sm:$0xff] }
  0x14   :  { %527 = vmatpush.msra.mxu1 %v1219_v23  ;;  %1364 = vmatpush.msra.mxu3 %v1219_v23  ;;  %v383_v51 = vld [vmem:[%s2112_s1 + $0x40] sm:$0xff]  ;;  %v384_v52 = vld [vmem:[%s2112_s1 + $0x48] sm:$0xff]  ;;  %v1311_v54 = vld [vmem:[%s2112_s1 + $0x158] sm:$0xff]  ;;  %v1716_v9 = vsel %vm214_vm2, %v216_v5, %v218_v6 }
  0x15   :  { %463 = vmatpush.msra.mxu0 %v1216_v24  ;;  %1357 = vmatpush.msra.mxu2 %v1216_v24  ;;  %v1638_v55 = vld [vmem:[%s2111_s0 + $0x18] sm:$0xff]  ;;  %v272_v56 = vld [vmem:[%s2115_s4 + $0x48] sm:$0xff]  ;;  %v112_v58 = vld [vmem:[%s2114_s3 + $0x50] sm:$0xff] }
  0x16   :  { %528 = vmatpush.msra.mxu1 %v1217_v25  ;;  %1365 = vmatpush.msra.mxu3 %v1217_v25  ;;  %v1646_v57 = vld [vmem:[%s2111_s0 + $0x58] sm:$0xff]  ;;  %v271_v59 = vld [vmem:[%s2115_s4 + $0x40] sm:$0xff]  ;;  %v381_v60 = vld [vmem:[%s2112_s1 + $0x30] sm:$0xff]  ;;  %v59_v18 = vrot.slane %v1638_v55, 7 }
  0x17   :  { %1233 = vmatmul.msk.f32.vlgmr.msra.gmra.mxu0 %vm408_vm1, %v1511_v26  ;;  %1241 = vmatmul.msk.f32.vlgmr.msra.gmra.mxu2 %vm408_vm1, %v1519_v28  ;;  %v382_v61 = vld [vmem:[%s2112_s1 + $0x38] sm:$0xff]  ;;  %v1308_v62 = vld [vmem:[%s2112_s1 + $0x140] sm:$0xff]  ;;  %v1309_v63 = vld [vmem:[%s2112_s1 + $0x148] sm:$0xff] }
  0x18   :  { %1250 = vmatmul.msk.f32.vlgmr.msra.gmra.mxu1 %vm408_vm1, %v1511_v26  ;;  %1258 = vmatmul.msk.f32.vlgmr.msra.gmra.mxu3 %vm408_vm1, %v1519_v28  ;;  %v1677_v0 = vld [vmem:[%s2111_s0 + $0x20] sm:$0xff]  ;;  %v273_v3 = vld [vmem:[%s2115_s4 + $0x50] sm:$0xff]  ;;  %v113_v4 = vld [vmem:[%s2114_s3 + $0x58] sm:$0xff]  ;;  %v1760_v21 = vsel %vm53_vm3, %v57_v17, %v59_v18 }
  0x19   :  { %1266 = vmatpush.msk.msrb.mxu2 %vm441_vm0, %v389_v31  ;;  %1283 = vmatpush.msk.msrb.mxu3 %vm441_vm0, %v390_v32  ;;  %v114_v1 = vld [vmem:[%s2114_s3 + $0x60] sm:$0xff]  ;;  %v1706_v7 = vld [vmem:[%s2111_s0 + $0x28] sm:$0xff]  ;;  %v1306_v11 = vld [vmem:[%s2112_s1 + $0x130] sm:$0xff]  ;;  %v220_v31 = vrot.slane %v1638_v55, 1  ;;  %v222_v32 = vrot.slane %v1677_v0, 1 }
  0x1a   :  { %150 = vperm.xlu2 %1370, %v108_v27   ;;  %1316 = vmatpush.msk.msrb.mxu0 %vm441_vm0, %v1314_v35  ;;  %v1685_v2 = vld [vmem:[%s2111_s0 + $0x60] sm:$0xff]  ;;  %v380_v10 = vld [vmem:[%s2112_s1 + $0x28] sm:$0xff]  ;;  %v1307_v12 = vld [vmem:[%s2112_s1 + $0x138] sm:$0xff] }
  0x1b   :  { %301 = vperm.xlu1 %1369, %v267_v29   ;;  %145 = vperm.xlu0 %1368, %v107_v30   ;;  %v379_v8 = vld [vmem:[%s2112_s1 + $0x20] sm:$0xff]  ;;  %v1733_v14 = vld [vmem:[%s2111_s0 + $0x68] sm:$0xff]  ;;  %v274_v16 = vld [vmem:[%s2115_s4 + $0x58] sm:$0xff]  ;;  %v1804_v35 = vsel %vm214_vm2, %v220_v31, %v222_v32 }
  0x1c   :  { %1333 = vmatpush.msk.msrb.mxu1 %vm441_vm0, %v1315_v36  ;;  %641 = vmatpush.msrb.mxu2 %v387_v33  ;;  %v275_v13 = vld [vmem:[%s2115_s4 + $0x60] sm:$0xff]  ;;  %v115_v15 = vld [vmem:[%s2114_s3 + $0x68] sm:$0xff]  ;;  %v1754_v19 = vld [vmem:[%s2111_s0 + $0x30] sm:$0xff] }
  0x1d   :  { %706 = vmatpush.msrb.mxu3 %v388_v34  ;;  %842 = vmatpush.msrb.mxu0 %v1312_v44  ;;  %v377_v20 = vld [vmem:[%s2112_s1 + $0x10] sm:$0xff]  ;;  %v378_v22 = vld [vmem:[%s2112_s1 + $0x18] sm:$0xff]  ;;  %v1304_v23 = vld [vmem:[%s2112_s1 + $0x120] sm:$0xff]  ;;  %v215_v44 = vrot.slane %v1511_v26, 1 }
  0x1e   :  { %642 = vmatpush.msrb.mxu2 %v385_v42  ;;  %907 = vmatpush.msrb.mxu1 %v1313_v45  ;;  %v1305_v24 = vld [vmem:[%s2112_s1 + $0x128] sm:$0xff]  ;;  %v117_v25 = vld [vmem:[%s2114_s3 + $0x78] sm:$0xff]  ;;  %v1777_v27 = vld [vmem:[%s2111_s0 + $0x70] sm:$0xff] }
  0x1f   :  { %1234 = vmatmul.msk.f32.gmra.mxu0 %vm408_vm1, %v1558_v37  ;;  %1242 = vmatmul.msk.f32.gmra.mxu2 %vm408_vm1, %v1568_v39  ;;  %v276_v29 = vld [vmem:[%s2115_s4 + $0x68] sm:$0xff]  ;;  %v116_v30 = vld [vmem:[%s2114_s3 + $0x70] sm:$0xff]  ;;  %v1798_v33 = vld [vmem:[%s2111_s0 + $0x38] sm:$0xff]  ;;  %v217_v45 = vsel %vm214_vm2, %v215_v44, %v216_v5  ;;  %v230_v44 = vrot.slane %v1519_v28, 1 }
  0x20   :  { %1251 = vmatmul.msk.f32.gmra.mxu1 %vm408_vm1, %v1558_v37  ;;  %1259 = vmatmul.msk.f32.gmra.mxu3 %vm408_vm1, %v1568_v39  ;;  %v375_v34 = vld [vmem:[%s2112_s1] sm:$0xff]  ;;  %v376_v36 = vld [vmem:[%s2112_s1 + $0x8] sm:$0xff]  ;;  %v278_v42 = vld [vmem:[%s2115_s4 + $0x78] sm:$0xff] }
  0x21   :  { %707 = vmatpush.msrb.mxu3 %v386_v43  ;;  %643 = vmatpush.msrb.mxu2 %v383_v51  ;;  %v277_v43 = vld [vmem:[%s2115_s4 + $0x70] sm:$0xff]  ;;  %v1301_v51 = vld [vmem:[%s2112_s1 + $0x108] sm:$0xff] }
  0x22   :  { %311 = vperm.xlu2 %1370, %v269_v38   ;;  %843 = vmatpush.msrb.mxu0 %v1310_v53  ;;  %v1302_v38 = vld [vmem:[%s2112_s1 + $0x110] sm:$0xff]  ;;  %v54_v53 = vrot.slane %v1511_v26, 7  ;;  %v221_v26 = vsel %vm214_vm2, %v218_v6, %v220_v31 }
  0x23   :  { %155 = vperm.xlu1 %1369, %v109_v40   ;;  %306 = vperm.xlu0 %1368, %v268_v41   ;;  %v1303_v40 = vld [vmem:[%s2112_s1 + $0x118] sm:$0xff] }
  0x24   :  { %708 = vmatpush.msrb.mxu3 %v384_v52  ;;  %908 = vmatpush.msrb.mxu1 %v1311_v54  ;;  %v1818_v41 = vld [vmem:[%s2111_s0 + $0x78] sm:$0xff]  ;;  %v226_v54 = vrot.slane %v1754_v19, 1 }
  0x25   :  { %644 = vmatpush.msrb.mxu2 %v381_v60  ;;  %844 = vmatpush.msrb.mxu0 %v1308_v62 }
  0x26   :  { %709 = vmatpush.msrb.mxu3 %v382_v61  ;;  %909 = vmatpush.msrb.mxu1 %v1309_v63  ;;  %v61_v61 = vrot.slane %v1677_v0, 7  ;;  %v224_v63 = vrot.slane %v1706_v7, 1 }
  0x27   :  { %1235 = vmatmul.msk.f32.gmra.mxu0 %vm408_vm1, %v1599_v46  ;;  %1243 = vmatmul.msk.f32.gmra.mxu2 %vm408_vm1, %v1607_v48 }
  0x28   :  { %1252 = vmatmul.msk.f32.gmra.mxu1 %vm408_vm1, %v1599_v46  ;;  %1260 = vmatmul.msk.f32.gmra.mxu3 %vm408_vm1, %v1607_v48  ;;  %v62_v62 = vsel %vm53_vm3, %v59_v18, %v61_v61  ;;  %v227_v6 = vsel %vm214_vm2, %v224_v63, %v226_v54 }
  0x29   :  { %645 = vmatpush.msrb.mxu2 %v379_v8  ;;  %710 = vmatpush.msrb.mxu3 %v380_v10 }
  0x2a   :  { %165 = vperm.xlu2 %1370, %v111_v47   ;;  %845 = vmatpush.msrb.mxu0 %v1306_v11  ;;  %v63_v47 = vrot.slane %v1706_v7, 7 }
  0x2b   :  { %316 = vperm.xlu1 %1369, %v270_v49   ;;  %160 = vperm.xlu0 %1368, %v110_v50   ;;  %v65_v49 = vrot.slane %v1754_v19, 7  ;;  %v1300_v50 = vld [vmem:[%s2112_s1 + $0x100] sm:$0xff] }
  0x2c   :  { %910 = vmatpush.msrb.mxu1 %v1307_v12  ;;  %646 = vmatpush.msrb.mxu2 %v377_v20 }
  0x2d   :  { %711 = vmatpush.msrb.mxu3 %v378_v22  ;;  %846 = vmatpush.msrb.mxu0 %v1304_v23  ;;  %v1847_v52 = vsel %vm53_vm3, %v63_v47, %v65_v49 }
  0x2e   :  { %911 = vmatpush.msrb.mxu1 %v1305_v24  ;;  %647 = vmatpush.msrb.mxu2 %v375_v34 }
  0x2f   :  { %1236 = vmatmul.msk.f32.gmra.mxu0 %vm408_vm1, %v1638_v55  ;;  %1244 = vmatmul.msk.f32.gmra.mxu2 %vm408_vm1, %v1646_v57 }
  0x30   :  { %1253 = vmatmul.msk.f32.gmra.mxu1 %vm408_vm1, %v1638_v55  ;;  %1261 = vmatmul.msk.f32.gmra.mxu3 %vm408_vm1, %v1646_v57  ;;  %v228_v55 = vrot.slane %v1798_v33, 1 }
  0x31   :  { %712 = vmatpush.msrb.mxu3 %v376_v36  ;;  %847 = vmatpush.msrb.mxu0 %v1302_v38 }
  0x32   :  { %326 = vperm.xlu2 %1370, %v272_v56   ;;  %912 = vmatpush.msrb.mxu1 %v1303_v40  ;;  %v55_v56 = vrot.slane %v1558_v37, 7  ;;  %v225_v37 = vsel %vm214_vm2, %v222_v32, %v224_v63 }
  0x33   :  { %170 = vperm.xlu1 %1369, %v112_v58   ;;  %321 = vperm.xlu0 %1368, %v271_v59   ;;  %v1856_v58 = vsel %vm214_vm2, %v226_v54, %v228_v55 }
  0x34   :  { %848 = vmatpush.msrb.mxu0 %v1300_v50  ;;  %913 = vmatpush.msrb.mxu1 %v1301_v51  ;;  %v58_v59 = vsel %vm53_vm3, %v55_v56, %v57_v17  ;;  %v56_v60 = vsel %vm53_vm3, %v54_v53, %v55_v56  ;;  %v231_v51 = vsel %vm214_vm2, %v228_v55, %v230_v44  ;;  %v232_v55 = vrot.slane %v1568_v39, 1 }
  0x37   :  { %1237 = vmatmul.msk.f32.gmra.mxu0 %vm408_vm1, %v1677_v0  ;;  %1245 = vmatmul.msk.f32.gmra.mxu2 %vm408_vm1, %v1685_v2 }
  0x38   :  { %1254 = vmatmul.msk.f32.gmra.mxu1 %vm408_vm1, %v1677_v0  ;;  %1262 = vmatmul.msk.f32.gmra.mxu3 %vm408_vm1, %v1685_v2 }
  0x3a   :  { %180 = vperm.xlu2 %1370, %v114_v1   ;;  %v64_v1 = vsel %vm53_vm3, %v61_v61, %v63_v47 }
  0x3b   :  { %331 = vperm.xlu1 %1369, %v273_v3   ;;  %175 = vperm.xlu0 %1368, %v113_v4   ;;  %v101_v3 = vsel %vm53_vm3, 0.0, %v54_v53  ;;  %v67_v4 = vrot.slane %v1798_v33, 7 }
  0x3d   :  { %v1873_v46 = vsel %vm53_vm3, %v65_v49, %v67_v4 }
  0x3f   :  { %1238 = vmatmul.msk.f32.gmra.mxu0 %vm408_vm1, %v1706_v7  ;;  %1246 = vmatmul.msk.f32.gmra.mxu2 %vm408_vm1, %v1733_v14 }
  0x40   :  { %1255 = vmatmul.msk.f32.gmra.mxu1 %vm408_vm1, %v1706_v7  ;;  %1263 = vmatmul.msk.f32.gmra.mxu3 %vm408_vm1, %v1733_v14 }
  0x42   :  { %341 = vperm.xlu2 %1370, %v275_v13  }
  0x43   :  { %185 = vperm.xlu1 %1369, %v115_v15   ;;  %336 = vperm.xlu0 %1368, %v274_v16  }
  0x47   :  { %1239 = vmatmul.msk.f32.gmra.mxu0 %vm408_vm1, %v1754_v19  ;;  %1247 = vmatmul.msk.f32.gmra.mxu2 %vm408_vm1, %v1777_v27 }
  0x48   :  { %1256 = vmatmul.msk.f32.gmra.mxu1 %vm408_vm1, %v1754_v19  ;;  %1264 = vmatmul.msk.f32.gmra.mxu3 %vm408_vm1, %v1777_v27 }
  0x4a   :  { %195 = vperm.xlu2 %1370, %v117_v25  }
  0x4b   :  { %346 = vperm.xlu1 %1369, %v276_v29   ;;  %190 = vperm.xlu0 %1368, %v116_v30  }
  0x4f   :  { %1240 = vmatmul.msk.f32.gmra.mxu0 %vm408_vm1, %v1798_v33  ;;  %1248 = vmatmul.msk.f32.gmra.mxu2 %vm408_vm1, %v1818_v41 }
  0x50   :  { %1257 = vmatmul.msk.f32.gmra.mxu1 %vm408_vm1, %v1798_v33  ;;  %1265 = vmatmul.msk.f32.gmra.mxu3 %vm408_vm1, %v1818_v41 }
  0x53   :  { %356 = vperm.xlu1 %1369, %v278_v42   ;;  %351 = vperm.xlu0 %1368, %v277_v43  }
  0x5c   :  { %v287_v7 = vpop.permute.xlu2 %286 }
  0x5d   :  { %v360_v11 = vmul.f32 %v287_v7, %v1716_v9 }
  0x64   :  { %v136_v16 = vpop.permute.xlu2 %135 }
  0x65   :  { %v201_v20 = vmul.f32 %v136_v16, %v1760_v21 }
  0x6c   :  { %v297_v22 = vpop.permute.xlu2 %296 }
  0x6d   :  { %v362_v23 = vmul.f32 %v297_v22, %v1804_v35 }
  0x74   :  { %v151_v21 = vpop.permute.xlu2 %150 }
  0x75   :  { %v282_v5 = vpop.permute.xlu1 %281  ;;  %v121_v8 = vpop.permute.xlu0 %120  ;;  %v204_v38 = vmul.f32 %v151_v21, %v1847_v52 }
  0x76   :  { %v359_v10 = vmul.f32 %v282_v5, %v217_v45  ;;  %v198_v0 = vmul.f32 %v121_v8, %v101_v3  ;;  %v234_v3 = vrot.slane %v1607_v48, 1 }
  0x78   :  { %1267 = vmatmul.msk.f32.vlgmr.msrb.gmra.mxu2 %vm408_vm1, %v198_v0  ;;  %1284 = vmatmul.msk.f32.vlgmr.msrb.gmra.mxu3 %vm408_vm1, %v198_v0 }
  0x79   :  { %1317 = vmatmul.msk.f32.vlgmr.msrb.gmra.mxu0 %vm408_vm1, %v359_v10  ;;  %1334 = vmatmul.msk.f32.vlgmr.msrb.gmra.mxu1 %vm408_vm1, %v359_v10 }
  0x7c   :  { %v312_v36 = vpop.permute.xlu2 %311 }
  0x7d   :  { %v126_v12 = vpop.permute.xlu0 %125  ;;  %v131_v15 = vpop.permute.xlu1 %130  ;;  %v365_v43 = vmul.f32 %v312_v36, %v1856_v58  ;;  %v69_v58 = vrot.slane %v1519_v28, 7  ;;  %v71_v28 = vrot.slane %v1568_v39, 7  ;;  %v235_v39 = vsel %vm214_vm2, %v232_v55, %v234_v3 }
  0x7e   :  { %v199_v13 = vmul.f32 %v126_v12, %v56_v60  ;;  %v200_v18 = vmul.f32 %v131_v15, %v58_v59  ;;  %v236_v12 = vrot.slane %v1646_v57, 1  ;;  %v240_v36 = vrot.slane %v1733_v14, 1 }
  0x7f   :  { %v70_v60 = vsel %vm53_vm3, %v67_v4, %v69_v58  ;;  %v72_v8 = vsel %vm53_vm3, %v69_v58, %v71_v28  ;;  %v242_v58 = vrot.slane %v1777_v27, 1 }
  0x80   :  { %1268 = vmatmul.msk.f32.gmra.mxu2 %vm408_vm1, %v199_v13  ;;  %1285 = vmatmul.msk.f32.gmra.mxu3 %vm408_vm1, %v199_v13 }
  0x81   :  { %1318 = vmatmul.msk.f32.gmra.mxu0 %vm408_vm1, %v360_v11  ;;  %1335 = vmatmul.msk.f32.gmra.mxu1 %vm408_vm1, %v360_v11 }
  0x84   :  { %v166_v59 = vpop.permute.xlu2 %165 }
  0x85   :  { %v292_v17 = vpop.permute.xlu0 %291  ;;  %v141_v9 = vpop.permute.xlu1 %140  ;;  %v207_v0 = vmul.f32 %v166_v59, %v72_v8  ;;  %v81_v8 = vrot.slane %v1777_v27, 7 }
  0x86   :  { %v361_v19 = vmul.f32 %v292_v17, %v221_v26  ;;  %v202_v29 = vmul.f32 %v141_v9, %v62_v62  ;;  %v233_v62 = vsel %vm214_vm2, %v230_v44, %v232_v55 }
  0x88   :  { %1269 = vmatmul.msk.f32.gmra.mxu2 %vm408_vm1, %v200_v18  ;;  %1286 = vmatmul.msk.f32.gmra.mxu3 %vm408_vm1, %v200_v18 }
  0x89   :  { %1319 = vmatmul.msk.f32.gmra.mxu0 %vm408_vm1, %v361_v19  ;;  %1336 = vmatmul.msk.f32.gmra.mxu1 %vm408_vm1, %v361_v19 }
  0x8c   :  { %v327_v10 = vpop.permute.xlu2 %326 }
  0x8d   :  { %v146_v24 = vpop.permute.xlu0 %145  ;;  %v302_v25 = vpop.permute.xlu1 %301 }
  0x8e   :  { %v363_v30 = vmul.f32 %v302_v25, %v225_v37  ;;  %v203_v32 = vmul.f32 %v146_v24, %v64_v1  ;;  %v238_v25 = vrot.slane %v1685_v2, 1 }
  0x90   :  { %1270 = vmatmul.msk.f32.gmra.mxu2 %vm408_vm1, %v201_v20  ;;  %1287 = vmatmul.msk.f32.gmra.mxu3 %vm408_vm1, %v201_v20  ;;  %v75_v20 = vrot.slane %v1646_v57, 7  ;;  %v239_v21 = vsel %vm214_vm2, %v236_v12, %v238_v25 }
  0x91   :  { %1320 = vmatmul.msk.f32.gmra.mxu0 %vm408_vm1, %v362_v23  ;;  %1337 = vmatmul.msk.f32.gmra.mxu1 %vm408_vm1, %v362_v23 }
  0x94   :  { %v1904_v40 = vpop.f32.mrf.mxu0  ;;  %v181_v24 = vpop.permute.xlu2 %180 }
  0x95   :  { %v307_v31 = vpop.permute.xlu0 %306  ;;  %v156_v35 = vpop.permute.xlu1 %155 }
  0x96   :  { %v364_v34 = vmul.f32 %v307_v31, %v227_v6  ;;  %v1906_v42 = vpop.f32.mrf.mxu1  ;;  %v205_v52 = vmul.f32 %v156_v35, %v1873_v46  ;;  %v368_v46 = vmul.f32 %v327_v10, %v235_v39  ;;  %v73_v6 = vrot.slane %v1607_v48, 7 }
  0x97   :  { %v237_v48 = vsel %vm214_vm2, %v234_v3, %v236_v12 }
  0x98   :  { %1271 = vmatmul.msk.f32.gmra.mxu2 %vm408_vm1, %v202_v29  ;;  %1288 = vmatmul.msk.f32.gmra.mxu3 %vm408_vm1, %v202_v29  ;;  %v74_v15 = vsel %vm53_vm3, %v71_v28, %v73_v6  ;;  %v76_v29 = vsel %vm53_vm3, %v73_v6, %v75_v20 }
  0x99   :  { %1321 = vmatmul.msk.f32.gmra.mxu0 %vm408_vm1, %v363_v30  ;;  %1338 = vmatmul.msk.f32.gmra.mxu1 %vm408_vm1, %v363_v30 }
  0x9a   :  { %v1914_v47 = vpop.f32.mrf.mxu2 }
  0x9b   :  { %v1916_v49 = vpop.f32.mrf.mxu3 }
  0x9c   :  { %v1924_v54 = vpop.f32.mrf.mxu0 }
  0x9d   :  { %v161_v45 = vpop.permute.xlu0 %160  ;;  %v317_v50 = vpop.permute.xlu1 %316 }
  0x9e   :  { %v366_v53 = vmul.f32 %v317_v50, %v231_v51  ;;  %v1926_v56 = vpop.f32.mrf.mxu1  ;;  %v206_v37 = vmul.f32 %v161_v45, %v70_v60  ;;  %v342_v50 = vpop.permute.xlu2 %341 }
  0xa0   :  { %1272 = vmatmul.msk.f32.gmra.mxu2 %vm408_vm1, %v203_v32  ;;  %1289 = vmatmul.msk.f32.gmra.mxu3 %vm408_vm1, %v203_v32 }
  0xa1   :  { %1322 = vmatmul.msk.f32.gmra.mxu0 %vm408_vm1, %v364_v34  ;;  %1339 = vmatmul.msk.f32.gmra.mxu1 %vm408_vm1, %v364_v34  ;;  %v77_v34 = vrot.slane %v1685_v2, 7  ;;  %v241_v2 = vsel %vm214_vm2, %v238_v25, %v240_v36 }
  0xa2   :  { %v1936_v26 = vpop.f32.mrf.mxu2 }
  0xa3   :  { %v1938_v63 = vpop.f32.mrf.mxu3 }
  0xa4   :  { %v1946_v4 = vpop.f32.mrf.mxu0 }
  0xa5   :  { %v322_v61 = vpop.permute.xlu0 %321  ;;  %v171_v33 = vpop.permute.xlu1 %170 }
  0xa6   :  { %v367_v1 = vmul.f32 %v322_v61, %v233_v62  ;;  %v1948_v5 = vpop.f32.mrf.mxu1  ;;  %v208_v19 = vmul.f32 %v171_v33, %v74_v15  ;;  %v244_v33 = vrot.slane %v1818_v41, 1 }
  0xa8   :  { %1273 = vmatmul.msk.f32.gmra.mxu2 %vm408_vm1, %v204_v38  ;;  %1290 = vmatmul.msk.f32.gmra.mxu3 %vm408_vm1, %v204_v38  ;;  %v245_v6 = vsel %vm214_vm2, %v242_v58, %v244_v33 }
  0xa9   :  { %1323 = vmatmul.msk.f32.gmra.mxu0 %vm408_vm1, %v365_v43  ;;  %1340 = vmatmul.msk.f32.gmra.mxu1 %vm408_vm1, %v365_v43  ;;  %v78_v43 = vsel %vm53_vm3, %v75_v20, %v77_v34  ;;  %v262_v20 = vsel %vm214_vm2, %v244_v33, 0.0 }
  0xaa   :  { %v1953_v7 = vpop.f32.mrf.mxu2  ;;  %v210_v51 = vmul.f32 %v181_v24, %v78_v43 }
  0xab   :  { %v1955_v11 = vpop.f32.mrf.mxu3 }
  0xac   :  { %v1964_v17 = vpop.f32.mrf.mxu0 }
  0xad   :  { %v176_v13 = vpop.permute.xlu0 %175  ;;  %v332_v16 = vpop.permute.xlu1 %331 }
  0xae   :  { %v1966_v18 = vpop.f32.mrf.mxu1  ;;  %v369_v9 = vmul.f32 %v332_v16, %v237_v48  ;;  %v209_v31 = vmul.f32 %v176_v13, %v76_v29  ;;  %v83_v13 = vrot.slane %v1818_v41, 7  ;;  %v196_v48 = vpop.permute.xlu2 %195 }
  0xb0   :  { %1274 = vmatmul.msk.f32.gmra.mxu2 %vm408_vm1, %v205_v52  ;;  %1291 = vmatmul.msk.f32.gmra.mxu3 %vm408_vm1, %v205_v52  ;;  %v371_v52 = vmul.f32 %v342_v50, %v241_v2 }
  0xb1   :  { %1324 = vmatmul.msk.f32.gmra.mxu0 %vm408_vm1, %v366_v53  ;;  %1341 = vmatmul.msk.f32.gmra.mxu1 %vm408_vm1, %v366_v53  ;;  %v79_v53 = vrot.slane %v1733_v14, 7  ;;  %v243_v14 = vsel %vm214_vm2, %v240_v36, %v242_v58 }
  0xb2   :  { %v1973_v22 = vpop.f32.mrf.mxu2 }
  0xb3   :  { %v1975_v23 = vpop.f32.mrf.mxu3  ;;  %v80_v61 = vsel %vm53_vm3, %v77_v34, %v79_v53 }
  0xb4   :  { %v1980_v32 = vpop.f32.mrf.mxu0 }
  0xb5   :  { %v337_v30 = vpop.permute.xlu0 %336  ;;  %v186_v38 = vpop.permute.xlu1 %185 }
  0xb6   :  { %v1982_v57 = vpop.f32.mrf.mxu1  ;;  %v370_v35 = vmul.f32 %v337_v30, %v239_v21 }
  0xb8   :  { %1275 = vmatmul.msk.f32.gmra.mxu2 %vm408_vm1, %v206_v37  ;;  %1292 = vmatmul.msk.f32.gmra.mxu3 %vm408_vm1, %v206_v37 }
  0xb9   :  { %1325 = vmatmul.msk.f32.gmra.mxu0 %vm408_vm1, %v367_v1  ;;  %1342 = vmatmul.msk.f32.gmra.mxu1 %vm408_vm1, %v367_v1  ;;  %v211_v1 = vmul.f32 %v186_v38, %v80_v61 }
  0xba   :  { %v1991_v44 = vpop.f32.mrf.mxu2 }
  0xbb   :  { %v1993_v45 = vpop.f32.mrf.mxu3 }
  0xbc   :  { %v2000_v59 = vpop.f32.mrf.mxu0 }
  0xbd   :  { %v191_v60 = vpop.permute.xlu0 %190  ;;  %v347_v62 = vpop.permute.xlu1 %346 }
  0xbe   :  { %v2002_v55 = vpop.f32.mrf.mxu1  ;;  %v372_v3 = vmul.f32 %v347_v62, %v243_v14 }
  0xc0   :  { %1276 = vmatmul.msk.f32.gmra.mxu2 %vm408_vm1, %v207_v0  ;;  %1293 = vmatmul.msk.f32.gmra.mxu3 %vm408_vm1, %v207_v0  ;;  %v82_v0 = vsel %vm53_vm3, %v79_v53, %v81_v8 }
  0xc1   :  { %1326 = vmatmul.msk.f32.gmra.mxu0 %vm408_vm1, %v368_v46  ;;  %1343 = vmatmul.msk.f32.gmra.mxu1 %vm408_vm1, %v368_v46  ;;  %v212_v12 = vmul.f32 %v191_v60, %v82_v0 }
  0xc2   :  { %v2008_v37 = vpop.f32.mrf.mxu2 }
  0xc3   :  { %v2010_v28 = vpop.f32.mrf.mxu3 }
  0xc4   :  { %v2018_v10 = vpop.f32.mrf.mxu0 }
  0xc5   :  { %v352_v46 = vpop.permute.xlu0 %351 }
  0xc6   :  { %v2020_v39 = vpop.f32.mrf.mxu1  ;;  %v373_v15 = vmul.f32 %v352_v46, %v245_v6 }
  0xc8   :  { %1277 = vmatmul.msk.f32.gmra.mxu2 %vm408_vm1, %v208_v19  ;;  %1294 = vmatmul.msk.f32.gmra.mxu3 %vm408_vm1, %v208_v19  ;;  %v84_v19 = vsel %vm53_vm3, %v81_v8, %v83_v13 }
  0xc9   :  { %1327 = vmatmul.msk.f32.gmra.mxu0 %vm408_vm1, %v369_v9  ;;  %1344 = vmatmul.msk.f32.gmra.mxu1 %vm408_vm1, %v369_v9  ;;  %v357_v9 = vpop.permute.xlu1 %356  ;;  %v213_v25 = vmul.f32 %v196_v48, %v84_v19 }
  0xca   :  { %v2025_v16 = vpop.f32.mrf.mxu2  ;;  %v374_v29 = vmul.f32 %v357_v9, %v262_v20 }
  0xcb   :  { %v2027_v27 = vpop.f32.mrf.mxu3 }
  0xcc   :  { %v2035_v41 = vpop.f32.mrf.mxu0 }
  0xce   :  { %v2037_v24 = vpop.f32.mrf.mxu1 }
  0xd0   :  { %1278 = vmatmul.msk.f32.gmra.mxu2 %vm408_vm1, %v209_v31  ;;  %1295 = vmatmul.msk.f32.gmra.mxu3 %vm408_vm1, %v209_v31 }
  0xd1   :  { %1328 = vmatmul.msk.f32.gmra.mxu0 %vm408_vm1, %v370_v35  ;;  %1345 = vmatmul.msk.f32.gmra.mxu1 %vm408_vm1, %v370_v35 }
  0xd2   :  { %v2043_v30 = vpop.f32.mrf.mxu2 }
  0xd3   :  { %v2045_v21 = vpop.f32.mrf.mxu3 }
  0xd8   :  { %1279 = vmatmul.msk.f32.gmra.mxu2 %vm408_vm1, %v210_v51  ;;  %1296 = vmatmul.msk.f32.gmra.mxu3 %vm408_vm1, %v210_v51 }
  0xd9   :  { %1329 = vmatmul.msk.f32.gmra.mxu0 %vm408_vm1, %v371_v52  ;;  %1346 = vmatmul.msk.f32.gmra.mxu1 %vm408_vm1, %v371_v52 }
  0xe0   :  { %1280 = vmatmul.msk.f32.gmra.mxu2 %vm408_vm1, %v211_v1  ;;  %1297 = vmatmul.msk.f32.gmra.mxu3 %vm408_vm1, %v211_v1 }
  0xe1   :  { %1330 = vmatmul.msk.f32.gmra.mxu0 %vm408_vm1, %v372_v3  ;;  %1347 = vmatmul.msk.f32.gmra.mxu1 %vm408_vm1, %v372_v3 }
  0xe8   :  { %1281 = vmatmul.msk.f32.gmra.mxu2 %vm408_vm1, %v212_v12  ;;  %1298 = vmatmul.msk.f32.gmra.mxu3 %vm408_vm1, %v212_v12 }
  0xe9   :  { %1331 = vmatmul.msk.f32.gmra.mxu0 %vm408_vm1, %v373_v15  ;;  %1348 = vmatmul.msk.f32.gmra.mxu1 %vm408_vm1, %v373_v15 }
  0xf0   :  { %1282 = vmatmul.msk.f32.gmra.mxu2 %vm408_vm1, %v213_v25  ;;  %1299 = vmatmul.msk.f32.gmra.mxu3 %vm408_vm1, %v213_v25 }
  0xf1   :  { %1332 = vmatmul.msk.f32.gmra.mxu0 %vm408_vm1, %v374_v29  ;;  %1349 = vmatmul.msk.f32.gmra.mxu1 %vm408_vm1, %v374_v29 }
  0xf6   :  { %v850_v31 = vpop.f32.mrf.mxu0  ;;  %v915_v34 = vpop.f32.mrf.mxu1 }
  0xfb   :  { %v649_v35 = vpop.f32.mrf.mxu2  ;;  %v714_v36 = vpop.f32.mrf.mxu3 }
  0xfc   :  { %v650_v38 = vadd.f32 %v649_v35, %v1904_v40  ;;  %v715_v43 = vadd.f32 %v714_v36, %v1906_v42 }
  0xfe   :  { %v963_v50 = vadd.f32 %v850_v31, %v650_v38  ;;  %v964_v2 = vadd.f32 %v915_v34, %v715_v43  ;;  %v853_v51 = vpop.f32.mrf.mxu0  ;;  %v918_v52 = vpop.f32.mrf.mxu1 }
 0x103   :  { %v652_v53 = vpop.f32.mrf.mxu2  ;;  %v717_v58 = vpop.f32.mrf.mxu3 }
 0x104   :  { %v653_v60 = vadd.f32 %v652_v53, %v1924_v54  ;;  %v718_v61 = vadd.f32 %v717_v58, %v1926_v56 }
 0x106   :  { %v965_v62 = vadd.f32 %v853_v51, %v653_v60  ;;  %v966_v14 = vadd.f32 %v918_v52, %v718_v61  ;;  %v856_v1 = vpop.f32.mrf.mxu0  ;;  %v921_v3 = vpop.f32.mrf.mxu1 }
 0x108   :  { %v995_v33 = vmax.f32 %v963_v50, %v965_v62  ;;  %v1002_v8 = vmax.f32 %v964_v2, %v966_v14 }
 0x10a   :  { %v996_v6 = vrot.slane %v995_v33, 4  ;;  %v1003_v12 = vrot.slane %v1002_v8, 4 }
 0x10b   :  { %v655_v0 = vpop.f32.mrf.mxu2  ;;  %v720_v40 = vpop.f32.mrf.mxu3 }
 0x10c   :  { %v656_v42 = vadd.f32 %v655_v0, %v1946_v4  ;;  %v721_v46 = vadd.f32 %v720_v40, %v1948_v5  ;;  %v997_v19 = vmax.f32 %v995_v33, %v996_v6  ;;  %v1004_v56 = vmax.f32 %v1002_v8, %v1003_v12 }
 0x10e   :  { %v967_v13 = vadd.f32 %v856_v1, %v656_v42  ;;  %v968_v15 = vadd.f32 %v921_v3, %v721_v46  ;;  %v859_v48 = vpop.f32.mrf.mxu0  ;;  %v924_v54 = vpop.f32.mrf.mxu1  ;;  %v998_v31 = vrot.slane %v997_v19, 2  ;;  %v1005_v34 = vrot.slane %v1004_v56, 2  ;;  %v1107_v1 = vld [vmem:[%s2113_s2] sm:$0x3]  ;;  %s1398_s2 = smov [#allocation2]  }
 0x10f   :  { %s1205_s8 = sshll.u32 %s1398_s2, 4  ;;  %s1206_s8 = int_to_ptr.vmem [resolvable:$true] %s1205_s8 }
 0x110   :  { %v999_v50 = vmax.f32 %v997_v19, %v998_v31  ;;  %v1006_v2 = vmax.f32 %v1004_v56, %v1005_v34 }
 0x112   :  { %v1000_v62 = vrot.slane %v999_v50, 1  ;;  %v1007_v14 = vrot.slane %v1006_v2, 1 }
 0x113   :  { %v658_v9 = vpop.f32.mrf.mxu2  ;;  %v723_v20 = vpop.f32.mrf.mxu3 }
 0x114   :  { %v659_v25 = vadd.f32 %v658_v9, %v1964_v17  ;;  %v724_v29 = vadd.f32 %v723_v20, %v1966_v18  ;;  %v1001_v12 = vmax.f32 %v999_v50, %v1000_v62 }
 0x116   :  { %v969_v35 = vadd.f32 %v859_v48, %v659_v25  ;;  %v970_v4 = vadd.f32 %v924_v54, %v724_v29  ;;  %v862_v36 = vpop.f32.mrf.mxu0  ;;  %v927_v5 = vpop.f32.mrf.mxu1 }
 0x118   :  { %v1009_v38 = vmax.f32 %v967_v13, %v969_v35  ;;  %v1016_v43 = vmax.f32 %v968_v15, %v970_v4  ;;  %v2060_v13 = vperm.slane %v1107_v1, 0  ;;  %v2062_v15 = vperm.slane %v1107_v1, 1 }
 0x11a   :  { %v1010_v51 = vrot.slane %v1009_v38, 4  ;;  %v1017_v52 = vrot.slane %v1016_v43, 4  ;;  %v1113_v29 = vadd.f32 %v2060_v13, %v1001_v12 }
 0x11b   :  { %v661_v53 = vpop.f32.mrf.mxu2  ;;  %v726_v58 = vpop.f32.mrf.mxu3 }
 0x11c   :  { %v1011_v60 = vmax.f32 %v1009_v38, %v1010_v51  ;;  %v1018_v61 = vmax.f32 %v1016_v43, %v1017_v52  ;;  %v662_v17 = vadd.f32 %v661_v53, %v1980_v32  ;;  %v727_v18 = vadd.f32 %v726_v58, %v1982_v57 }
 0x11d   :  { %v1008_v32 = vmax.f32 %v1006_v2, %v1007_v14  ;;  %v1129_v52 = vmax.f32 %v1113_v29, 0.0 }
 0x11e   :  { %v1012_v3 = vrot.slane %v1011_v60, 2  ;;  %v1019_v33 = vrot.slane %v1018_v61, 2  ;;  %v971_v8 = vadd.f32 %v862_v36, %v662_v17  ;;  %v972_v0 = vadd.f32 %v927_v5, %v727_v18  ;;  %v865_v40 = vpop.f32.mrf.mxu0  ;;  %v930_v42 = vpop.f32.mrf.mxu1 }
 0x11f   :  { %v1114_v31 = vadd.f32 %v2062_v15, %v1008_v32 }
 0x120   :  { %v1013_v46 = vmax.f32 %v1011_v60, %v1012_v3  ;;  %v1020_v6 = vmax.f32 %v1018_v61, %v1019_v33 }
 0x122   :  { %v1014_v57 = vrot.slane %v1013_v46, 1  ;;  %v1021_v48 = vrot.slane %v1020_v6, 1 }
 0x123   :  { %v664_v54 = vpop.f32.mrf.mxu2  ;;  %v729_v19 = vpop.f32.mrf.mxu3 }
 0x124   :  { %v1015_v56 = vmax.f32 %v1013_v46, %v1014_v57  ;;  %v1022_v9 = vmax.f32 %v1020_v6, %v1021_v48  ;;  %v665_v20 = vadd.f32 %v664_v54, %v2000_v59  ;;  %v730_v25 = vadd.f32 %v729_v19, %v2002_v55 }
 0x125   :  { %v1130_v59 = vmax.f32 %v1114_v31, 0.0 }
 0x126   :  { %v1115_v34 = vadd.f32 %v2060_v13, %v1015_v56  ;;  %v1116_v35 = vadd.f32 %v2062_v15, %v1022_v9  ;;  %v973_v4 = vadd.f32 %v865_v40, %v665_v20  ;;  %v974_v36 = vadd.f32 %v930_v42, %v730_v25  ;;  %v868_v5 = vpop.f32.mrf.mxu0  ;;  %v933_v38 = vpop.f32.mrf.mxu1 }
 0x128   :  { %v1131_v43 = vmax.f32 %v1115_v34, 0.0  ;;  %v1132_v50 = vmax.f32 %v1116_v35, 0.0  ;;  %v1023_v2 = vmax.f32 %v971_v8, %v973_v4  ;;  %v1030_v51 = vmax.f32 %v972_v0, %v974_v36 }
 0x12a   :  { %v1161_v55 = vrot.slane %v1131_v43, 7  ;;  %v1182_v53 = vrot.slane %v1132_v50, 7  ;;  %v1024_v58 = vrot.slane %v1023_v2, 4  ;;  %v1031_v60 = vrot.slane %v1030_v51, 4 }
 0x12b   :  { %v667_v61 = vpop.f32.mrf.mxu2  ;;  %v732_v17 = vpop.f32.mrf.mxu3 }
 0x12c   :  { %v1163_v18 = vsel %vm1162_vm4, %v1161_v55, %v1129_v52  ;;  %v1183_v62 = vsel %vm1162_vm4, %v1182_v53, %v1130_v59  ;;  %v1025_v14 = vmax.f32 %v1023_v2, %v1024_v58  ;;  %v1032_v1 = vmax.f32 %v1030_v51, %v1031_v60 }
 0x12d   :  { %v668_v3 = vadd.f32 %v667_v61, %v2018_v10  ;;  %v733_v33 = vadd.f32 %v732_v17, %v2020_v39 }
 0x12e   :  { %v1026_v40 = vrot.slane %v1025_v14, 2  ;;  %v1033_v8 = vrot.slane %v1032_v1, 2  ;;  %v871_v0 = vpop.f32.mrf.mxu0  ;;  %v936_v42 = vpop.f32.mrf.mxu1 }
 0x12f   :  { %v975_v46 = vadd.f32 %v868_v5, %v668_v3  ;;  %v976_v6 = vadd.f32 %v933_v38, %v733_v33 }
 0x130   :  { %v1027_v12 = vmax.f32 %v1025_v14, %v1026_v40  ;;  %v1034_v32 = vmax.f32 %v1032_v1, %v1033_v8 }
 0x132   :  { %v1028_v57 = vrot.slane %v1027_v12, 1  ;;  %v1035_v48 = vrot.slane %v1034_v32, 1 }
 0x133   :  { %v670_v54 = vpop.f32.mrf.mxu2  ;;  %v735_v19 = vpop.f32.mrf.mxu3 }
 0x134   :  { %v1029_v56 = vmax.f32 %v1027_v12, %v1028_v57  ;;  %v1036_v9 = vmax.f32 %v1034_v32, %v1035_v48  ;;  %v671_v20 = vadd.f32 %v670_v54, %v2035_v41  ;;  %v736_v10 = vadd.f32 %v735_v19, %v2037_v24 }
 0x136   :  { %v1117_v39 = vadd.f32 %v2060_v13, %v1029_v56  ;;  %v1118_v25 = vadd.f32 %v2062_v15, %v1036_v9  ;;  %v977_v29 = vadd.f32 %v871_v0, %v671_v20  ;;  %v978_v31 = vadd.f32 %v936_v42, %v736_v10  ;;  %v874_v34 = vpop.f32.mrf.mxu0  ;;  %v939_v35 = vpop.f32.mrf.mxu1 }
 0x138   :  { %v1133_v4 = vmax.f32 %v1117_v39, 0.0  ;;  %v1134_v36 = vmax.f32 %v1118_v25, 0.0  ;;  %v1037_v5 = vmax.f32 %v975_v46, %v977_v29  ;;  %v1044_v38 = vmax.f32 %v976_v6, %v978_v31 }
 0x13a   :  { %v1164_v43 = vrot.slane %v1133_v4, 6  ;;  %v1184_v50 = vrot.slane %v1134_v36, 6  ;;  %v1038_v2 = vrot.slane %v1037_v5, 4  ;;  %v1045_v51 = vrot.slane %v1044_v38, 4 }
 0x13b   :  { %v673_v41 = vpop.f32.mrf.mxu2  ;;  %v738_v52 = vpop.f32.mrf.mxu3 }
 0x13c   :  { %v1039_v24 = vmax.f32 %v1037_v5, %v1038_v2  ;;  %v1046_v59 = vmax.f32 %v1044_v38, %v1045_v51  ;;  %v1166_v55 = vsel %vm1165_vm5, %v1164_v43, %v1163_v18  ;;  %v1185_v53 = vsel %vm1165_vm5, %v1184_v50, %v1183_v62 }
 0x13d   :  { %v674_v43 = vadd.f32 %v673_v41, %v1914_v47  ;;  %v739_v50 = vadd.f32 %v738_v52, %v1916_v49 }
 0x13e   :  { %v1040_v58 = vrot.slane %v1039_v24, 2  ;;  %v1047_v60 = vrot.slane %v1046_v59, 2  ;;  %v877_v61 = vpop.f32.mrf.mxu0  ;;  %v942_v17 = vpop.f32.mrf.mxu1 }
 0x140   :  { %v1041_v14 = vmax.f32 %v1039_v24, %v1040_v58  ;;  %v1048_v1 = vmax.f32 %v1046_v59, %v1047_v60  ;;  %v979_v60 = vadd.f32 %v874_v34, %v674_v43 }
 0x142   :  { %v1042_v3 = vrot.slane %v1041_v14, 1  ;;  %v1049_v33 = vrot.slane %v1048_v1, 1 }
 0x143   :  { %v676_v40 = vpop.f32.mrf.mxu2  ;;  %v741_v8 = vpop.f32.mrf.mxu3 }
 0x144   :  { %v1043_v0 = vmax.f32 %v1041_v14, %v1042_v3  ;;  %v1050_v42 = vmax.f32 %v1048_v1, %v1049_v33  ;;  %v677_v4 = vadd.f32 %v676_v40, %v1936_v26  ;;  %v742_v36 = vadd.f32 %v741_v8, %v1938_v63 }
 0x145   :  { %v980_v63 = vadd.f32 %v939_v35, %v739_v50 }
 0x146   :  { %v1119_v46 = vadd.f32 %v2060_v13, %v1043_v0  ;;  %v1120_v6 = vadd.f32 %v2062_v15, %v1050_v42  ;;  %v880_v12 = vpop.f32.mrf.mxu0  ;;  %v945_v32 = vpop.f32.mrf.mxu1 }
 0x148   :  { %v1135_v18 = vmax.f32 %v1119_v46, 0.0  ;;  %v1136_v62 = vmax.f32 %v1120_v6, 0.0 }
 0x14a   :  { %v1167_v57 = vrot.slane %v1135_v18, 5  ;;  %v1186_v48 = vrot.slane %v1136_v62, 5 }
 0x14b   :  { %v679_v54 = vpop.f32.mrf.mxu2  ;;  %v744_v19 = vpop.f32.mrf.mxu3 }
 0x14c   :  { %v2078_v56 = vsel %vm1168_vm6, %v1167_v57, %v1166_v55  ;;  %v2080_v9 = vsel %vm1168_vm6, %v1186_v48, %v1185_v53  ;;  %v680_v2 = vadd.f32 %v679_v54, %v1953_v7  ;;  %v745_v51 = vadd.f32 %v744_v19, %v1955_v11 }
 0x14d   :  { %v981_v55 = vadd.f32 %v877_v61, %v677_v4  ;;  %v982_v53 = vadd.f32 %v942_v17, %v742_v36 }
 0x14e   :  { %v883_v20 = vpop.f32.mrf.mxu0  ;;  %v948_v10 = vpop.f32.mrf.mxu1  ;;  %v983_v14 = vadd.f32 %v880_v12, %v680_v2 }
 0x14f   :  { %v1051_v3 = vmax.f32 %v979_v60, %v981_v55  ;;  %v1058_v47 = vmax.f32 %v980_v63, %v982_v53 }
 0x151   :  { %v1052_v34 = vrot.slane %v1051_v3, 4  ;;  %v1059_v35 = vrot.slane %v1058_v47, 4 }
 0x153   :  { %v682_v39 = vpop.f32.mrf.mxu2  ;;  %v747_v25 = vpop.f32.mrf.mxu3  ;;  %v1053_v18 = vmax.f32 %v1051_v3, %v1052_v34 }
 0x154   :  { %v683_v5 = vadd.f32 %v682_v39, %v1973_v22  ;;  %v748_v38 = vadd.f32 %v747_v25, %v1975_v23  ;;  %v984_v22 = vadd.f32 %v945_v32, %v745_v51 }
 0x155   :  { %v1054_v39 = vrot.slane %v1053_v18, 2 }
 0x156   :  { %v886_v29 = vpop.f32.mrf.mxu0  ;;  %v951_v31 = vpop.f32.mrf.mxu1  ;;  %v985_v58 = vadd.f32 %v883_v20, %v683_v5  ;;  %v986_v26 = vadd.f32 %v948_v10, %v748_v38 }
 0x157   :  { %v1055_v5 = vmax.f32 %v1053_v18, %v1054_v39 }
 0x158   :  { %v1065_v41 = vmax.f32 %v983_v14, %v985_v58  ;;  %v1072_v49 = vmax.f32 %v984_v22, %v986_v26 }
 0x159   :  { %v1056_v60 = vrot.slane %v1055_v5, 1 }
 0x15a   :  { %v1066_v40 = vrot.slane %v1065_v41, 4  ;;  %v1073_v8 = vrot.slane %v1072_v49, 4 }
 0x15b   :  { %v685_v24 = vpop.f32.mrf.mxu2  ;;  %v750_v59 = vpop.f32.mrf.mxu3 }
 0x15c   :  { %v686_v7 = vadd.f32 %v685_v24, %v1991_v44  ;;  %v751_v11 = vadd.f32 %v750_v59, %v1993_v45  ;;  %v1060_v44 = vmax.f32 %v1058_v47, %v1059_v35  ;;  %v1067_v62 = vmax.f32 %v1065_v41, %v1066_v40 }
 0x15d   :  { %v1074_v45 = vmax.f32 %v1072_v49, %v1073_v8 }
 0x15e   :  { %v889_v1 = vpop.f32.mrf.mxu0  ;;  %v954_v23 = vpop.f32.mrf.mxu1  ;;  %v987_v0 = vadd.f32 %v886_v29, %v686_v7  ;;  %v988_v42 = vadd.f32 %v951_v31, %v751_v11  ;;  %v1061_v25 = vrot.slane %v1060_v44, 2  ;;  %v1068_v29 = vrot.slane %v1067_v62, 2 }
 0x15f   :  { %v1075_v31 = vrot.slane %v1074_v45, 2 }
 0x160   :  { %v1062_v38 = vmax.f32 %v1060_v44, %v1061_v25  ;;  %v1069_v43 = vmax.f32 %v1067_v62, %v1068_v29 }
 0x161   :  { %v1076_v50 = vmax.f32 %v1074_v45, %v1075_v31 }
 0x162   :  { %v1063_v63 = vrot.slane %v1062_v38, 1  ;;  %v1070_v14 = vrot.slane %v1069_v43, 1 }
 0x163   :  { %v688_v52 = vpop.f32.mrf.mxu2  ;;  %v753_v33 = vpop.f32.mrf.mxu3  ;;  %v1077_v22 = vrot.slane %v1076_v50, 1 }
 0x164   :  { %v689_v61 = vadd.f32 %v688_v52, %v2008_v37  ;;  %v754_v17 = vadd.f32 %v753_v33, %v2010_v28  ;;  %v1057_v52 = vmax.f32 %v1055_v5, %v1056_v60  ;;  %v1064_v33 = vmax.f32 %v1062_v38, %v1063_v63 }
 0x166   :  { %v989_v46 = vadd.f32 %v889_v1, %v689_v61  ;;  %v990_v6 = vadd.f32 %v954_v23, %v754_v17  ;;  %v892_v54 = vpop.f32.mrf.mxu0  ;;  %v957_v37 = vpop.f32.mrf.mxu1  ;;  %v1071_v61 = vmax.f32 %v1069_v43, %v1070_v14 }
 0x168   :  { %v1079_v12 = vmax.f32 %v987_v0, %v989_v46  ;;  %v1086_v32 = vmax.f32 %v988_v42, %v990_v6  ;;  %v1121_v0 = vadd.f32 %v2060_v13, %v1057_v52  ;;  %v1122_v42 = vadd.f32 %v2062_v15, %v1064_v33 }
 0x169   :  { %v1123_v46 = vadd.f32 %v2060_v13, %v1071_v61 }
 0x16a   :  { %v1080_v57 = vrot.slane %v1079_v12, 4  ;;  %v1087_v48 = vrot.slane %v1086_v32, 4 }
 0x16b   :  { %v691_v19 = vpop.f32.mrf.mxu2  ;;  %v756_v28 = vpop.f32.mrf.mxu3 }
 0x16c   :  { %v1081_v20 = vmax.f32 %v1079_v12, %v1080_v57  ;;  %v1088_v10 = vmax.f32 %v1086_v32, %v1087_v48  ;;  %v692_v2 = vadd.f32 %v691_v19, %v2025_v16  ;;  %v757_v51 = vadd.f32 %v756_v28, %v2027_v27 }
 0x16d   :  { %v1137_v57 = vmax.f32 %v1121_v0, 0.0  ;;  %v1138_v48 = vmax.f32 %v1122_v42, 0.0 }
 0x16e   :  { %v1082_v4 = vrot.slane %v1081_v20, 2  ;;  %v1089_v36 = vrot.slane %v1088_v10, 2  ;;  %v895_v1 = vpop.f32.mrf.mxu0  ;;  %v960_v23 = vpop.f32.mrf.mxu1  ;;  %v991_v3 = vadd.f32 %v892_v54, %v692_v2  ;;  %v992_v47 = vadd.f32 %v957_v37, %v757_v51 }
 0x16f   :  { %v1139_v54 = vmax.f32 %v1123_v46, 0.0  ;;  %v1170_v29 = vrot.slane %v1137_v57, 4  ;;  %v1188_v31 = vrot.slane %v1138_v48, 4 }
 0x170   :  { %v1083_v24 = vmax.f32 %v1081_v20, %v1082_v4  ;;  %v1090_v59 = vmax.f32 %v1088_v10, %v1089_v36 }
 0x171   :  { %v1173_v4 = vrot.slane %v1139_v54, 3 }
 0x172   :  { %v1084_v49 = vrot.slane %v1083_v24, 1  ;;  %v1091_v27 = vrot.slane %v1090_v59, 1 }
 0x173   :  { %v694_v55 = vpop.f32.mrf.mxu2  ;;  %v759_v53 = vpop.f32.mrf.mxu3 }
 0x174   :  { %v695_v58 = vadd.f32 %v694_v55, %v2043_v30  ;;  %v760_v26 = vadd.f32 %v759_v53, %v2045_v21  ;;  %v1078_v30 = vmax.f32 %v1076_v50, %v1077_v22  ;;  %v1085_v34 = vmax.f32 %v1083_v24, %v1084_v49 }
 0x175   :  { %v1092_v35 = vmax.f32 %v1090_v59, %v1091_v27  ;;  %v1172_v24 = vsel %vm1171_vm7, %v1170_v29, %v2078_v56  ;;  %v1189_v59 = vsel %vm1171_vm7, %v1188_v31, %v2080_v9 }
 0x176   :  { %v993_v41 = vadd.f32 %v895_v1, %v695_v58  ;;  %v994_v16 = vadd.f32 %v960_v23, %v760_v26  ;;  %v1124_v6 = vadd.f32 %v2062_v15, %v1078_v30  ;;  %v1125_v18 = vadd.f32 %v2060_v13, %v1085_v34 }
 0x177   :  { %v1126_v44 = vadd.f32 %v2062_v15, %v1092_v35 }
 0x178   :  { %v1093_v7 = vmax.f32 %v991_v3, %v993_v41  ;;  %v1100_v11 = vmax.f32 %v992_v47, %v994_v16  ;;  %v1140_v37 = vmax.f32 %v1124_v6, 0.0  ;;  %v1141_v20 = vmax.f32 %v1125_v18, 0.0 }
 0x179   :  { %v1142_v10 = vmax.f32 %v1126_v44, 0.0 }
 0x17a   :  { %v1094_v17 = vrot.slane %v1093_v7, 4  ;;  %v1101_v21 = vrot.slane %v1100_v11, 4  ;;  %v1190_v36 = vrot.slane %v1140_v37, 3  ;;  %v1176_v43 = vrot.slane %v1141_v20, 2 }
 0x17b   :  { %v1192_v50 = vrot.slane %v1142_v10, 2 }
 0x17c   :  { %v1095_v40 = vmax.f32 %v1093_v7, %v1094_v17  ;;  %v1102_v8 = vmax.f32 %v1100_v11, %v1101_v21 }
 0x17e   :  { %v1096_v12 = vrot.slane %v1095_v40, 2  ;;  %v1103_v32 = vrot.slane %v1102_v8, 2 }
 0x180   :  { %v1097_v62 = vmax.f32 %v1095_v40, %v1096_v12  ;;  %v1104_v45 = vmax.f32 %v1102_v8, %v1103_v32 }
 0x182   :  { %v1098_v19 = vrot.slane %v1097_v62, 1  ;;  %v1105_v28 = vrot.slane %v1104_v45, 1 }
 0x184   :  { %v1099_v39 = vmax.f32 %v1097_v62, %v1098_v19  ;;  %v1106_v25 = vmax.f32 %v1104_v45, %v1105_v28 }
 0x186   :  { %v1127_v5 = vadd.f32 %v2060_v13, %v1099_v39  ;;  %v1128_v38 = vadd.f32 %v2062_v15, %v1106_v25  ;;  %v1175_v13 = vsel %vm1174_vm8, %v1173_v4, %v1172_v24  ;;  %v1191_v15 = vsel %vm1174_vm8, %v1190_v36, %v1189_v59 }
 0x187   :  { %v1178_v58 = vsel %vm1177_vm9, %v1176_v43, %v1175_v13  ;;  %v1193_v26 = vsel %vm1177_vm9, %v1192_v50, %v1191_v15 }
 0x188   :  { %v1143_v2 = vmax.f32 %v1127_v5, 0.0  ;;  %v1144_v51 = vmax.f32 %v1128_v38, 0.0 }
 0x18a   :  { %v1179_v55 = vrot.slane %v1143_v2, 1  ;;  %v1194_v53 = vrot.slane %v1144_v51, 1 }
 0x18c   :  { %v1181_v60 = vsel %vm1180_vm10, %v1179_v55, %v1178_v58  ;;  %v1195_v63 = vsel %vm1180_vm10, %v1194_v53, %v1193_v26 }
 0x18d   :  { %1198 = vst [vmem:[#allocation2] sm:$0xff] %v1181_v60 }
 0x18e   :  { %1199 = vst [vmem:[#allocation2 + $0x8] sm:$0xff] %v1195_v63 }
 0x18f   :  { %1210 = dma.vmem_to_hbm [thread:$0]  %s1206_s8, 256, %s1208_s11, [#allocation3]  }
 0x190   :  { %1395 = dma.done.wait [#allocation3], 256  }
 0x191   :  { %1396 = vsyncadd [#allocation3], 4294967040 }
 0x192   :  { %1215 = vsyncpa [#allocation3], 1 }

</bundles_post_ra>
